<compile_context>
chip_gen: v5e
topology: v5e:2x2
jax: 0.10.0
libtpu: 0.0.40
codegen_flags: <defaults>
</compile_context>

<pallas_src>
import jax
import jax.numpy as jnp
import numpy as np
from jax.experimental import pallas as pl
from jax.experimental.pallas import tpu as pltpu


# ----------------------------------------------------------------------------
# Pallas kernel: one grid step == one (H, TB, C) batch tile, full H and C.
# ----------------------------------------------------------------------------
def cbam_kernel(x_ref, w1t_ref, w2t_ref, coef_a_ref, coef_m_ref, out_ref):
    x = x_ref[...]                              # (H, TB, C) float32
    H = x.shape[0]

    # ---- channel attention (MXU work issued first; its latency hides under the
    #      XLU roll chain of the spatial branch) ------------------------------
    avg_c = jnp.mean(x, axis=0)                 # (TB, C)  AdaptiveAvgPool2d(1) over H
    max_c = jnp.max(x, axis=0)                  # (TB, C)  AdaptiveMaxPool2d(1) over H
    # fc(avg) + fc(max) with the shared MLP: ReLU is the only nonlinearity, so
    # fc(avg)+fc(max) = (relu(avg@W1^T) + relu(max@W1^T)) @ W2^T  -- no stacking,
    # no scratch, plain (TB,C)x(C,Cr)/(TB,Cr)x(Cr,C) matmuls.
    h_avg = jnp.maximum(
        jnp.dot(avg_c, w1t_ref[...], preferred_element_type=jnp.float32), 0.0)
    h_max = jnp.maximum(
        jnp.dot(max_c, w1t_ref[...], preferred_element_type=jnp.float32), 0.0)
    chan = jax.nn.sigmoid(
        jnp.dot(h_avg + h_max, w2t_ref[...], preferred_element_type=jnp.float32))  # (TB, C)

    # ---- spatial attention ----------------------------------------------------
    # Channel-wise mean/max.  The lane reduction over C is correct because the
    # block always covers the full C dimension (padded lanes are masked by Mosaic).
    avg_s = jnp.mean(x, axis=2)                 # (H, TB)
    max_s = jnp.max(x, axis=2)                  # (H, TB)
    # 7-tap conv along H (NCHW width is 1, so only the centre column of the 7x7
    # kernel touches real data).  Shifts are XLU sublane rotations; taps that would
    # read the zero padding are killed by the zero-folded coefficients
    # (coef_*[k, h, :] == 0 whenever h + k - 3 is outside [0, H)), so the circular
    # wrap of pltpu.roll never contributes -- do not remove the zero-folding.
    acc = coef_a_ref[3] * avg_s + coef_m_ref[3] * max_s       # centre tap, no roll
    for k in range(7):                                        # static unroll
        if k == 3:
            continue
        sh = (3 - k) % H
        acc = acc + coef_a_ref[k] * pltpu.roll(avg_s, shift=sh, axis=0) \
                  + coef_m_ref[k] * pltpu.roll(max_s, shift=sh, axis=0)
    spa = jax.nn.sigmoid(acc)                   # (H, TB)

    # ---- fuse:  out_chan * out_spa = x^2 * chan * spa ---------------------------
    # chan broadcasts over H (outer dim, free); spa broadcasts over the C lanes.
    out_ref[...] = (x * x) * chan[None, :, :] * spa[:, :, None]


# ----------------------------------------------------------------------------
# Wrapper: batch-tiled pallas_call (all layout plumbing in plain JAX)
# ----------------------------------------------------------------------------
def cbam_forward(x, params, *, b_tile=8):
    H, B, C = x.shape
    # Batch tile: multiple of 8 (sublane-aligned second-minor block) when possible,
    # else fall back to the full batch (full-dim blocks are always legal).
    TB = b_tile if (B % b_tile == 0) else B
    grid = (B // TB,)

    w1t = params["w1t"]                         # (C, Cr)
    w2t = params["w2t"]                         # (Cr, C)
    Cr = w1t.shape[1]
    # Pre-broadcast the zero-folded conv coefficients across the TB lanes (free,
    # wrapper-side) so the kernel never lane-slices / lane-broadcasts them.
    coef_a = jnp.broadcast_to(params["coef_a"], (7, H, TB))
    coef_m = jnp.broadcast_to(params["coef_m"], (7, H, TB))

    return pl.pallas_call(
        cbam_kernel,
        out_shape=jax.ShapeDtypeStruct((H, B, C), x.dtype),
        grid_spec=pltpu.PrefetchScalarGridSpec(
            num_scalar_prefetch=0,
            grid=grid,
            in_specs=[
                pl.BlockSpec((H, TB, C), lambda b: (0, b, 0)),   # x batch tile
                pl.BlockSpec((C, Cr), lambda b: (0, 0)),         # W1^T (resident)
                pl.BlockSpec((Cr, C), lambda b: (0, 0)),         # W2^T (resident)
                pl.BlockSpec((7, H, TB), lambda b: (0, 0, 0)),   # avg-branch conv taps
                pl.BlockSpec((7, H, TB), lambda b: (0, 0, 0)),   # max-branch conv taps
            ],
            out_specs=pl.BlockSpec((H, TB, C), lambda b: (0, b, 0)),
        ),
        compiler_params=pltpu.CompilerParams(
            dimension_semantics=("parallel",)),                  # megacore over B tiles
    )(x, w1t, w2t, coef_a, coef_m)


def init_params(key, C, H, reduction_ratio=16, kernel_size=7):
    Cr = max(C // reduction_ratio, 1)
    k1, k2, k3 = jax.random.split(key, 3)
    # ChannelAttention.fc: Conv2d(C, Cr, 1, bias=False) then Conv2d(Cr, C, 1, bias=False)
    W1 = jax.random.normal(k1, (Cr, C), jnp.float32) * 0.3
    W2 = jax.random.normal(k2, (C, Cr), jnp.float32) * 0.3
    # SpatialAttention.conv: Conv2d(2, 1, 7, padding=3, bias=False).  The NCHW width
    # is 1, so only the centre column (index 3) of the 7x7 kernel acts on real data.
    Wsp = jax.random.normal(k3, (1, 2, kernel_size, kernel_size), jnp.float32) * 0.3
    wsp_c = Wsp[0, :, :, kernel_size // 2]                       # (2, 7): [avg; max] taps

    # Per-(tap, row) coefficients with the conv's zero padding folded in.
    rows = jnp.arange(H)[None, :]                                # (1, H)
    taps = jnp.arange(kernel_size)[:, None]                      # (7, 1)
    off = rows + taps - kernel_size // 2
    valid = (off >= 0) & (off < H)                               # (7, H)
    coef_a = jnp.where(valid, wsp_c[0][:, None], 0.0)[:, :, None]  # (7, H, 1)
    coef_m = jnp.where(valid, wsp_c[1][:, None], 0.0)[:, :, None]  # (7, H, 1)

    kernel_params = dict(w1t=W1.T, w2t=W2.T, coef_a=coef_a, coef_m=coef_m)
    raw_params = dict(W1=W1, W2=W2, wsp=wsp_c)
    return kernel_params, raw_params


# ----------------------------------------------------------------------------
# Pure-JAX reference mirroring the PyTorch CBAM.forward exactly (for validation)
# ----------------------------------------------------------------------------
def reference(x, p):
    H, B, C = x.shape
    xb = jnp.transpose(x, (1, 2, 0))                 # (B, C, H) ~ NCHW with W=1
    # channel attention
    avg = xb.mean(axis=2)
    mx = xb.max(axis=2)
    fc = lambda v: jnp.maximum(v @ p["W1"].T, 0.0) @ p["W2"].T
    chan = jax.nn.sigmoid(fc(avg) + fc(mx))          # (B, C)
    # spatial attention: 7-tap conv along H, zero padded
    sa = jnp.pad(xb.mean(axis=1), ((0, 0), (3, 3)))  # (B, H+6)
    sm = jnp.pad(xb.max(axis=1), ((0, 0), (3, 3)))
    lin = jnp.zeros((B, H), jnp.float32)
    for k in range(7):
        lin = lin + p["wsp"][0, k] * sa[:, k:k + H] + p["wsp"][1, k] * sm[:, k:k + H]
    spa = jax.nn.sigmoid(lin)                        # (B, H)
    o = (chan[:, :, None] * xb) * (spa[:, None, :] * xb)   # out_chan * out_spa
    return jnp.transpose(o, (2, 0, 1))               # (H, B, C)


if __name__ == "__main__":
    # (height/seq, batch, channels); B=16 exercises a real 2-step batch grid (TB=8);
    # C // 16 = 2 is the channel-attention bottleneck width.
    H, B, C = 8, 16, 32
    key = jax.random.PRNGKey(0)
    kx, kp = jax.random.split(key)
    x = jax.random.normal(kx, (H, B, C), jnp.float32)
    kernel_params, raw_params = init_params(kp, C, H)

    out = jax.block_until_ready(cbam_forward(x, kernel_params))
    ref = jax.block_until_ready(reference(x, raw_params))
    np.testing.assert_allclose(np.asarray(out), np.asarray(ref), rtol=1e-4, atol=1e-4)

    print("KERNEL_OK")
</pallas_src>

<mosaic_0001>
module attributes {stable_mosaic.version = 11 : i64} {
  func.func @cbam_kernel(%arg0: i32, %arg1: memref<8x8x32xf32, #tpu.memory_space<vmem>>, %arg2: memref<32x2xf32, #tpu.memory_space<vmem>>, %arg3: memref<2x32xf32, #tpu.memory_space<vmem>>, %arg4: memref<7x8x8xf32, #tpu.memory_space<vmem>>, %arg5: memref<7x8x8xf32, #tpu.memory_space<vmem>>, %arg6: memref<8x8x32xf32, #tpu.memory_space<vmem>>) attributes {dimension_semantics = [#tpu.dimension_semantics<parallel>], iteration_bounds = array<i64: 2>, scalar_prefetch = 0 : i64, scratch_operands = 0 : i64, tpu.core_type = #tpu.core_type<tc>, window_params = [{transform_indices = @transform_0, window_bounds = array<i64: 8, 8, 32>}, {pipeline_mode = #tpu.pipeline_mode<synchronous>, transform_indices = @transform_1, window_bounds = array<i64: 32, 2>}, {pipeline_mode = #tpu.pipeline_mode<synchronous>, transform_indices = @transform_2, window_bounds = array<i64: 2, 32>}, {pipeline_mode = #tpu.pipeline_mode<synchronous>, transform_indices = @transform_3, window_bounds = array<i64: 7, 8, 8>}, {pipeline_mode = #tpu.pipeline_mode<synchronous>, transform_indices = @transform_4, window_bounds = array<i64: 7, 8, 8>}, {transform_indices = @transform_5, window_bounds = array<i64: 8, 8, 32>}]} {
    %c0 = arith.constant 0 : index
    %c0_0 = arith.constant 0 : index
    %c0_1 = arith.constant 0 : index
    %0 = vector.load %arg1[%c0, %c0_0, %c0_1] : memref<8x8x32xf32, #tpu.memory_space<vmem>>, vector<8x8x32xf32>
    %cst = arith.constant dense<0.000000e+00> : vector<8x32xf32>
    %1 = vector.multi_reduction <add>, %0, %cst [0] : vector<8x8x32xf32> to vector<8x32xf32>
    %cst_2 = arith.constant 8.000000e+00 : f32
    %2 = vector.broadcast %cst_2 : f32 to vector<8x32xf32>
    %3 = arith.divf %1, %2 : vector<8x32xf32>
    %cst_3 = arith.constant dense<0xFF800000> : vector<8x32xf32>
    %4 = vector.multi_reduction <maximumf>, %0, %cst_3 [0] : vector<8x8x32xf32> to vector<8x32xf32>
    %c0_4 = arith.constant 0 : index
    %c0_5 = arith.constant 0 : index
    %5 = vector.load %arg2[%c0_4, %c0_5] : memref<32x2xf32, #tpu.memory_space<vmem>>, vector<32x2xf32>
    %cst_6 = arith.constant dense<0.000000e+00> : vector<8x2xf32>
    %6 = tpu.matmul %3, %5, %cst_6 {dimension_numbers = #tpu.dot_dimension_numbers<[1], [0], [0], [1], [0, 0, 1, 1], [], []>} : vector<8x32xf32>, vector<32x2xf32>, vector<8x2xf32> -> vector<8x2xf32>
    %cst_7 = arith.constant 0.000000e+00 : f32
    %7 = vector.broadcast %cst_7 : f32 to vector<8x2xf32>
    %8 = arith.maximumf %6, %7 : vector<8x2xf32>
    %c0_8 = arith.constant 0 : index
    %c0_9 = arith.constant 0 : index
    %9 = vector.load %arg2[%c0_8, %c0_9] : memref<32x2xf32, #tpu.memory_space<vmem>>, vector<32x2xf32>
    %cst_10 = arith.constant dense<0.000000e+00> : vector<8x2xf32>
    %10 = tpu.matmul %4, %9, %cst_10 {dimension_numbers = #tpu.dot_dimension_numbers<[1], [0], [0], [1], [0, 0, 1, 1], [], []>} : vector<8x32xf32>, vector<32x2xf32>, vector<8x2xf32> -> vector<8x2xf32>
    %cst_11 = arith.constant 0.000000e+00 : f32
    %11 = vector.broadcast %cst_11 : f32 to vector<8x2xf32>
    %12 = arith.maximumf %10, %11 : vector<8x2xf32>
    %13 = arith.addf %8, %12 : vector<8x2xf32>
    %c0_12 = arith.constant 0 : index
    %c0_13 = arith.constant 0 : index
    %14 = vector.load %arg3[%c0_12, %c0_13] : memref<2x32xf32, #tpu.memory_space<vmem>>, vector<2x32xf32>
    %cst_14 = arith.constant dense<0.000000e+00> : vector<8x32xf32>
    %15 = tpu.matmul %13, %14, %cst_14 {dimension_numbers = #tpu.dot_dimension_numbers<[1], [0], [0], [1], [0, 0, 1, 1], [], []>} : vector<8x2xf32>, vector<2x32xf32>, vector<8x32xf32> -> vector<8x32xf32>
    %16 = arith.negf %15 : vector<8x32xf32>
    %17 = math.exp %16 : vector<8x32xf32>
    %cst_15 = arith.constant 1.000000e+00 : f32
    %18 = vector.broadcast %cst_15 : f32 to vector<8x32xf32>
    %19 = arith.addf %18, %17 : vector<8x32xf32>
    %20 = arith.divf %18, %19 : vector<8x32xf32>
    %cst_16 = arith.constant dense<0.000000e+00> : vector<8x8xf32>
    %21 = vector.multi_reduction <add>, %0, %cst_16 [2] : vector<8x8x32xf32> to vector<8x8xf32>
    %cst_17 = arith.constant 3.200000e+01 : f32
    %22 = vector.broadcast %cst_17 : f32 to vector<8x8xf32>
    %23 = arith.divf %21, %22 : vector<8x8xf32>
    %cst_18 = arith.constant dense<0xFF800000> : vector<8x8xf32>
    %24 = vector.multi_reduction <maximumf>, %0, %cst_18 [2] : vector<8x8x32xf32> to vector<8x8xf32>
    %c3 = arith.constant 3 : index
    %c0_19 = arith.constant 0 : index
    %c0_20 = arith.constant 0 : index
    %25 = vector.load %arg4[%c3, %c0_19, %c0_20] : memref<7x8x8xf32, #tpu.memory_space<vmem>>, vector<1x8x8xf32>
    %26 = vector.shape_cast %25 : vector<1x8x8xf32> to vector<8x8xf32>
    %27 = arith.mulf %26, %23 : vector<8x8xf32>
    %c3_21 = arith.constant 3 : index
    %c0_22 = arith.constant 0 : index
    %c0_23 = arith.constant 0 : index
    %28 = vector.load %arg5[%c3_21, %c0_22, %c0_23] : memref<7x8x8xf32, #tpu.memory_space<vmem>>, vector<1x8x8xf32>
    %29 = vector.shape_cast %28 : vector<1x8x8xf32> to vector<8x8xf32>
    %30 = arith.mulf %29, %24 : vector<8x8xf32>
    %31 = arith.addf %27, %30 : vector<8x8xf32>
    %c0_24 = arith.constant 0 : index
    %c0_25 = arith.constant 0 : index
    %c0_26 = arith.constant 0 : index
    %32 = vector.load %arg4[%c0_24, %c0_25, %c0_26] : memref<7x8x8xf32, #tpu.memory_space<vmem>>, vector<1x8x8xf32>
    %33 = vector.shape_cast %32 : vector<1x8x8xf32> to vector<8x8xf32>
    %c3_i32 = arith.constant 3 : i32
    %34 = tpu.dynamic_rotate %23 by %c3_i32 dim 0 : vector<8x8xf32>, i32 -> vector<8x8xf32>
    %35 = arith.mulf %33, %34 : vector<8x8xf32>
    %36 = arith.addf %31, %35 : vector<8x8xf32>
    %c0_27 = arith.constant 0 : index
    %c0_28 = arith.constant 0 : index
    %c0_29 = arith.constant 0 : index
    %37 = vector.load %arg5[%c0_27, %c0_28, %c0_29] : memref<7x8x8xf32, #tpu.memory_space<vmem>>, vector<1x8x8xf32>
    %38 = vector.shape_cast %37 : vector<1x8x8xf32> to vector<8x8xf32>
    %c3_i32_30 = arith.constant 3 : i32
    %39 = tpu.dynamic_rotate %24 by %c3_i32_30 dim 0 : vector<8x8xf32>, i32 -> vector<8x8xf32>
    %40 = arith.mulf %38, %39 : vector<8x8xf32>
    %41 = arith.addf %36, %40 : vector<8x8xf32>
    %c1 = arith.constant 1 : index
    %c0_31 = arith.constant 0 : index
    %c0_32 = arith.constant 0 : index
    %42 = vector.load %arg4[%c1, %c0_31, %c0_32] : memref<7x8x8xf32, #tpu.memory_space<vmem>>, vector<1x8x8xf32>
    %43 = vector.shape_cast %42 : vector<1x8x8xf32> to vector<8x8xf32>
    %c2_i32 = arith.constant 2 : i32
    %44 = tpu.dynamic_rotate %23 by %c2_i32 dim 0 : vector<8x8xf32>, i32 -> vector<8x8xf32>
    %45 = arith.mulf %43, %44 : vector<8x8xf32>
    %46 = arith.addf %41, %45 : vector<8x8xf32>
    %c1_33 = arith.constant 1 : index
    %c0_34 = arith.constant 0 : index
    %c0_35 = arith.constant 0 : index
    %47 = vector.load %arg5[%c1_33, %c0_34, %c0_35] : memref<7x8x8xf32, #tpu.memory_space<vmem>>, vector<1x8x8xf32>
    %48 = vector.shape_cast %47 : vector<1x8x8xf32> to vector<8x8xf32>
    %c2_i32_36 = arith.constant 2 : i32
    %49 = tpu.dynamic_rotate %24 by %c2_i32_36 dim 0 : vector<8x8xf32>, i32 -> vector<8x8xf32>
    %50 = arith.mulf %48, %49 : vector<8x8xf32>
    %51 = arith.addf %46, %50 : vector<8x8xf32>
    %c2 = arith.constant 2 : index
    %c0_37 = arith.constant 0 : index
    %c0_38 = arith.constant 0 : index
    %52 = vector.load %arg4[%c2, %c0_37, %c0_38] : memref<7x8x8xf32, #tpu.memory_space<vmem>>, vector<1x8x8xf32>
    %53 = vector.shape_cast %52 : vector<1x8x8xf32> to vector<8x8xf32>
    %c1_i32 = arith.constant 1 : i32
    %54 = tpu.dynamic_rotate %23 by %c1_i32 dim 0 : vector<8x8xf32>, i32 -> vector<8x8xf32>
    %55 = arith.mulf %53, %54 : vector<8x8xf32>
    %56 = arith.addf %51, %55 : vector<8x8xf32>
    %c2_39 = arith.constant 2 : index
    %c0_40 = arith.constant 0 : index
    %c0_41 = arith.constant 0 : index
    %57 = vector.load %arg5[%c2_39, %c0_40, %c0_41] : memref<7x8x8xf32, #tpu.memory_space<vmem>>, vector<1x8x8xf32>
    %58 = vector.shape_cast %57 : vector<1x8x8xf32> to vector<8x8xf32>
    %c1_i32_42 = arith.constant 1 : i32
    %59 = tpu.dynamic_rotate %24 by %c1_i32_42 dim 0 : vector<8x8xf32>, i32 -> vector<8x8xf32>
    %60 = arith.mulf %58, %59 : vector<8x8xf32>
    %61 = arith.addf %56, %60 : vector<8x8xf32>
    %c4 = arith.constant 4 : index
    %c0_43 = arith.constant 0 : index
    %c0_44 = arith.constant 0 : index
    %62 = vector.load %arg4[%c4, %c0_43, %c0_44] : memref<7x8x8xf32, #tpu.memory_space<vmem>>, vector<1x8x8xf32>
    %63 = vector.shape_cast %62 : vector<1x8x8xf32> to vector<8x8xf32>
    %c7_i32 = arith.constant 7 : i32
    %64 = tpu.dynamic_rotate %23 by %c7_i32 dim 0 : vector<8x8xf32>, i32 -> vector<8x8xf32>
    %65 = arith.mulf %63, %64 : vector<8x8xf32>
    %66 = arith.addf %61, %65 : vector<8x8xf32>
    %c4_45 = arith.constant 4 : index
    %c0_46 = arith.constant 0 : index
    %c0_47 = arith.constant 0 : index
    %67 = vector.load %arg5[%c4_45, %c0_46, %c0_47] : memref<7x8x8xf32, #tpu.memory_space<vmem>>, vector<1x8x8xf32>
    %68 = vector.shape_cast %67 : vector<1x8x8xf32> to vector<8x8xf32>
    %c7_i32_48 = arith.constant 7 : i32
    %69 = tpu.dynamic_rotate %24 by %c7_i32_48 dim 0 : vector<8x8xf32>, i32 -> vector<8x8xf32>
    %70 = arith.mulf %68, %69 : vector<8x8xf32>
    %71 = arith.addf %66, %70 : vector<8x8xf32>
    %c5 = arith.constant 5 : index
    %c0_49 = arith.constant 0 : index
    %c0_50 = arith.constant 0 : index
    %72 = vector.load %arg4[%c5, %c0_49, %c0_50] : memref<7x8x8xf32, #tpu.memory_space<vmem>>, vector<1x8x8xf32>
    %73 = vector.shape_cast %72 : vector<1x8x8xf32> to vector<8x8xf32>
    %c6_i32 = arith.constant 6 : i32
    %74 = tpu.dynamic_rotate %23 by %c6_i32 dim 0 : vector<8x8xf32>, i32 -> vector<8x8xf32>
    %75 = arith.mulf %73, %74 : vector<8x8xf32>
    %76 = arith.addf %71, %75 : vector<8x8xf32>
    %c5_51 = arith.constant 5 : index
    %c0_52 = arith.constant 0 : index
    %c0_53 = arith.constant 0 : index
    %77 = vector.load %arg5[%c5_51, %c0_52, %c0_53] : memref<7x8x8xf32, #tpu.memory_space<vmem>>, vector<1x8x8xf32>
    %78 = vector.shape_cast %77 : vector<1x8x8xf32> to vector<8x8xf32>
    %c6_i32_54 = arith.constant 6 : i32
    %79 = tpu.dynamic_rotate %24 by %c6_i32_54 dim 0 : vector<8x8xf32>, i32 -> vector<8x8xf32>
    %80 = arith.mulf %78, %79 : vector<8x8xf32>
    %81 = arith.addf %76, %80 : vector<8x8xf32>
    %c6 = arith.constant 6 : index
    %c0_55 = arith.constant 0 : index
    %c0_56 = arith.constant 0 : index
    %82 = vector.load %arg4[%c6, %c0_55, %c0_56] : memref<7x8x8xf32, #tpu.memory_space<vmem>>, vector<1x8x8xf32>
    %83 = vector.shape_cast %82 : vector<1x8x8xf32> to vector<8x8xf32>
    %c5_i32 = arith.constant 5 : i32
    %84 = tpu.dynamic_rotate %23 by %c5_i32 dim 0 : vector<8x8xf32>, i32 -> vector<8x8xf32>
    %85 = arith.mulf %83, %84 : vector<8x8xf32>
    %86 = arith.addf %81, %85 : vector<8x8xf32>
    %c6_57 = arith.constant 6 : index
    %c0_58 = arith.constant 0 : index
    %c0_59 = arith.constant 0 : index
    %87 = vector.load %arg5[%c6_57, %c0_58, %c0_59] : memref<7x8x8xf32, #tpu.memory_space<vmem>>, vector<1x8x8xf32>
    %88 = vector.shape_cast %87 : vector<1x8x8xf32> to vector<8x8xf32>
    %c5_i32_60 = arith.constant 5 : i32
    %89 = tpu.dynamic_rotate %24 by %c5_i32_60 dim 0 : vector<8x8xf32>, i32 -> vector<8x8xf32>
    %90 = arith.mulf %88, %89 : vector<8x8xf32>
    %91 = arith.addf %86, %90 : vector<8x8xf32>
    %92 = arith.negf %91 : vector<8x8xf32>
    %93 = math.exp %92 : vector<8x8xf32>
    %cst_61 = arith.constant 1.000000e+00 : f32
    %94 = vector.broadcast %cst_61 : f32 to vector<8x8xf32>
    %95 = arith.addf %94, %93 : vector<8x8xf32>
    %96 = arith.divf %94, %95 : vector<8x8xf32>
    %97 = arith.mulf %0, %0 : vector<8x8x32xf32>
    %98 = vector.shape_cast %20 : vector<8x32xf32> to vector<1x8x32xf32>
    %99 = vector.broadcast %98 : vector<1x8x32xf32> to vector<8x8x32xf32>
    %100 = arith.mulf %97, %99 : vector<8x8x32xf32>
    %101 = vector.shape_cast %96 : vector<8x8xf32> to vector<8x8x1xf32>
    %102 = vector.broadcast %101 : vector<8x8x1xf32> to vector<8x8x32xf32>
    %103 = arith.mulf %100, %102 : vector<8x8x32xf32>
    %c0_62 = arith.constant 0 : index
    %c0_63 = arith.constant 0 : index
    %c0_64 = arith.constant 0 : index
    %104 = vector.load %arg6[%c0_62, %c0_63, %c0_64] : memref<8x8x32xf32, #tpu.memory_space<vmem>>, vector<8x8x32xf32>
    tpu.vector_store %arg6[%c0_62, %c0_63, %c0_64], %103 {strides = array<i32>} : memref<8x8x32xf32, #tpu.memory_space<vmem>>, vector<8x8x32xf32>,
    return
  }
  func.func @transform_0(%arg0: i32) -> (i32, i32, i32) {
    %c0_i32 = arith.constant 0 : i32
    %c0_i32_0 = arith.constant 0 : i32
    %c0_i32_1 = arith.constant 0 : i32
    return %c0_i32, %arg0, %c0_i32_0 : i32, i32, i32
  }
  func.func @transform_1(%arg0: i32) -> (i32, i32) {
    %c0_i32 = arith.constant 0 : i32
    %c0_i32_0 = arith.constant 0 : i32
    %c0_i32_1 = arith.constant 0 : i32
    return %c0_i32, %c0_i32_0 : i32, i32
  }
  func.func @transform_2(%arg0: i32) -> (i32, i32) {
    %c0_i32 = arith.constant 0 : i32
    %c0_i32_0 = arith.constant 0 : i32
    %c0_i32_1 = arith.constant 0 : i32
    return %c0_i32, %c0_i32_0 : i32, i32
  }
  func.func @transform_3(%arg0: i32) -> (i32, i32, i32) {
    %c0_i32 = arith.constant 0 : i32
    %c0_i32_0 = arith.constant 0 : i32
    %c0_i32_1 = arith.constant 0 : i32
    %c0_i32_2 = arith.constant 0 : i32
    return %c0_i32, %c0_i32_0, %c0_i32_1 : i32, i32, i32
  }
  func.func @transform_4(%arg0: i32) -> (i32, i32, i32) {
    %c0_i32 = arith.constant 0 : i32
    %c0_i32_0 = arith.constant 0 : i32
    %c0_i32_1 = arith.constant 0 : i32
    %c0_i32_2 = arith.constant 0 : i32
    return %c0_i32, %c0_i32_0, %c0_i32_1 : i32, i32, i32
  }
  func.func @transform_5(%arg0: i32) -> (i32, i32, i32) {
    %c0_i32 = arith.constant 0 : i32
    %c0_i32_0 = arith.constant 0 : i32
    %c0_i32_1 = arith.constant 0 : i32
    return %c0_i32, %arg0, %c0_i32_0 : i32, i32, i32
  }
}

</mosaic_0001>

<bundles_post_ra>
// kernel: tpu_custom_call.1
= control target key start
LH: loop header
LB: loop body
LE: loop exit
PB: predicated region body
PF: predicated region fallthrough
CT: control target
= control target key end

     0   :  { %10 = vsyncpa [#allocation3], 0  ;;  %s1421_s0 = inlined_call_operand.hbm [shape: f32[8,16,32], index: 0, kind: input, shape index: {}]   ;;  %s1422_s1 = inlined_call_operand.vmem [shape: f32[32,2], index: 1, kind: input, shape index: {}]   ;;  %s1423_s2 = inlined_call_operand.vmem [shape: f32[2,32], index: 2, kind: input, shape index: {}]   ;;  %s1424_s3 = inlined_call_operand.hbm [shape: f32[7,8,8], index: 3, kind: input, shape index: {}]   ;;  %s1425_s4 = inlined_call_operand.hbm [shape: f32[7,8,8], index: 4, kind: input, shape index: {}]   ;;  %s1426_s5 = inlined_call_operand.hbm [shape: f32[8,16,32], index: 5, kind: output, shape index: {}]  }
   0x1   :  { %12 = vsyncpa [#allocation3 + $0x1], 0 }
   0x2   :  { %13 = vsyncpa [#allocation6], 0 }
   0x3   :  { %14 = vsyncpa [#allocation4], 0 }
   0x4   :  { %16 = vsyncpa [#allocation4 + $0x1], 0  ;;  %s1122_s18 = smov 0   ;;  %s1124_s19 = smov 0  }
   0x5   :  { %s1126_s20 = smov 0   ;;  %s1128_s21 = smov 0  }
   0x6 LB: > { %s1143_s22 = sadd.s32 4294967295, %s1080_s21   ;;  %s808_s23 = sadd.s32 4294967294, %s1080_s21   ;;  %s1080_s21 = sphi %s1128_s21, %s1438_s21   ;;  %s1076_s20 = sphi %s1126_s20, %s1437_s20   ;;  %s1072_s19 = sphi %s1124_s19, %s1436_s19   ;;  %s1068_s18 = sphi %s1122_s18, %s1435_s18  }
   0x7   : > { %p42_p0 = scmp.ne.s32.totalorder %s1072_s19, %s1068_s18  ;;  %p43_p1 = scmp.eq.s32.totalorder %s1143_s22, 0 }
   0x8   : > { %p150_p2 = scmp.eq.s32.totalorder %s1143_s22, 1  ;;  %p156_p3 = scmp.eq.s32.totalorder %s808_s23, 1 }
   0x9   : > { %p1152_p4 = por %p43_p1, %p42_p0  ;;  %p809_p5 = scmp.ge.s32.totalorder %s1080_s21, 1 }
   0xa   : > { %p1157_p6 = por %p156_p3, %p42_p0  ;;  %p163_p7 = scmp.lt.s32.totalorder %s1080_s21, 3 }
   0xb   : > { %s180_s28 = sshll.u32 %s1424_s3, 4  ;;  %s1082_s30 = smov [#allocation5]   ;;  %s181_s28 = int_to_ptr.hbm [resolvable:$true] %s180_s28 }
   0xc   : > { %p1165_p8 = pnand %p809_p5, %p163_p7  ;;  %s182_s6 = sshll.u32 %s1082_s30, 4  ;;  %s183_s6 = int_to_ptr.vmem [resolvable:$true] %s182_s6 }
   0xd   : > { %s194_s9 = sshll.u32 %s1425_s4, 4  ;;  %s1427_s10 = smov 128   ;;  %s195_s9 = int_to_ptr.hbm [resolvable:$true] %s194_s9 }
   0xe   : > { %p842_p9 = pneg %p1165_p8  ;;  %s1084_s11 = smov 8  }
   0xf   : > { %s1085_s12 = smov [#allocation7]   ;;  %s1184_s14 = sadd.s32 1, %s1080_s21  }
  0x10   : > { %p843_p10 = pnand %p842_p9, %p43_p1  ;;  %s196_s13 = sshll.u32 %s1085_s12, 4  ;;  %s197_s13 = int_to_ptr.vmem [resolvable:$true] %s196_s13 }
  0x11   : > { %s29_s15 = sadd.s32 1, %s1076_s20  ;;  %s26_s16 = ssub.s32 %s1080_s21, %s1184_s14 }
  0x12   : > { %845 = dma.hbm_to_vmem [thread:$0]  (!%p843_p10), %s181_s28, 896, %s183_s6, [#allocation6], %s1427_s10, %s1427_s10, %s1084_s11  }
  0x13   : > { %848 = dma.hbm_to_vmem [thread:$0]  (!%p843_p10), %s195_s9, 896, %s197_s13, [#allocation6], %s1427_s10, %s1427_s10, %s1084_s11  }
  0x14   : > { %p36_p12 = scmp.ne.s32.totalorder %s1076_s20, %s1072_s19  ;;  %p27_p13 = scmp.eq.s32.totalorder %s26_s16, 0 }
  0x15   : > { %p37_p0 = scmp.eq.s32.totalorder %s1080_s21, 0  ;;  %p859_p5 = scmp.lt.s32.totalorder %s1080_s21, 2 }
  0x16   : > { %p1194_p3 = por %p150_p2, %p36_p12  ;;  %s210_s26 = sand.u32 1, %s1076_s20  }
  0x17   : > { %s1200_s23 = scalar_select %p27_p13, %s1076_s20, %s29_s15  }
  0x18   : > { %p38_p7 = por %p37_p0, %p36_p12  ;;  %s813_s27 = sshll.u32 %s210_s26, 6 }
  0x19   : > { %s814_s28 = sshll.u32 %s1080_s21, 3  ;;  %s214_s8 = scalar_lea.vmem [#allocation2], %s813_s27 }
  0x1a   : > { %s218_s7 = scalar_lea.hbm %s1421_s0, %s814_s28  ;;  %s221_s9 = sshll.u32 %s214_s8, 4  ;;  %s222_s9 = int_to_ptr.vmem [resolvable:$true] %s221_s9 }
  0x1b   : > { %s219_s12 = sshll.u32 %s218_s7, 4  ;;  %p1207_p2 = pnand %p859_p5, %p38_p7  ;;  %s220_s12 = int_to_ptr.hbm [resolvable:$true] %s219_s12 }
  0x1c   : > { %s211_s15 = scalar_lea.sflag [#allocation3], %s210_s26  ;;  %s980_s16 = sshra.s32 %s220_s12, 4  ;;  %s981_s16 = int_to_ptr.hbm [resolvable:$true] %s980_s16 }
  0x1d   : > { %s982_s10 = scalar_lea.hbm %s981_s16, 64  ;;  %p984_p10 = pneg %p1207_p2 }
  0x1e   : > { %p983_p9 = scmp.ne.s32.totalorder %s981_s16, %s982_s10  ;;  %s987_s30 = scalar_lea.hbm %s1421_s0, 128 }
  0x1f   : > { %p988_p0 = scmp.lt.s32.totalorder %s981_s16, %s1421_s0  ;;  %p989_p5 = scmp.lt.s32.totalorder %s987_s30, %s982_s10 }
  0x20   : > { %p985_p12 = pnand %p984_p10, %p983_p9 }
  0x21   : > { %p990_p7 = por %p989_p5, %p988_p0 }
  0x22   : > { %p986_p13 = pneg %p985_p12 }
  0x24   : > { %p991_p11 = pnand %p990_p7, %p986_p13 }
  0x26   : > { %994 = shalt.err (!%p991_p11)
}
  0x27   : > { %s1086_s26 = smov 256   ;;  %s1433_s8 = smov 128  }
  0x28   : > { %852 = dma.hbm_to_vmem [thread:$0]  (!%p1207_p2), %s220_s12, 1024, %s222_s9, %s211_s15, %s1086_s26, %s1433_s8, %s1084_s11  }
  0x29   : > { %233 = sbr.rel (%p1165_p8) target bundleno = 408 (0x198), region = 40  ;;  %s1226_s28 = sand.u32 (!%p1165_p8), 1, %s1072_s19  }
  0x2a   : > { %s816_s10 = sshll.u32 (!%p1165_p8), %s1226_s28, 6  ;;  %s236_s16 = scalar_lea.sflag (!%p1165_p8), [#allocation3], %s1226_s28 }
  0x2b   : > { %s1232_s27 = scalar_lea.vmem (!%p1165_p8), [#allocation2], %s816_s10 }
  0x2e   : > { %1055 = dma.done.wait (%p1152_p4), %s236_s16, 1024  }
  0x2f   : > { %1057 = vsyncadd (%p1152_p4), %s236_s16, 4294966272 }
  0x30   : > { %1059 = dma.done.wait (%p43_p1), [#allocation6], 1792  }
  0x31   : > { %1061 = vsyncadd (%p43_p1), [#allocation6], 4294965504  ;;  %vm285_vm0 = vcmask 261120   ;;  %v1087_v0 = vmov 8.0   ;;  %v1243_v1 = vld [vmem:[%s1232_s27 + $0x10] sm:$0xff]  ;;  %v1246_v2 = vld [vmem:[%s1232_s27] sm:$0xff] }
  0x32   : > { %908 = vrcp.f32 %v1087_v0  ;;  %v1249_v3 = vld [vmem:[%s1232_s27 + $0x20] sm:$0xff]  ;;  %v289_v4 = vsel %vm285_vm0, %v1243_v1, 0.0  ;;  %v309_v5 = vsel %vm285_vm0, %v1246_v2, -inf  ;;  %v286_v7 = vsel %vm285_vm0, %v1246_v2, 0.0  ;;  %v1262_v8 = vld [vmem:[%s1232_s27 + $0x18] sm:$0xff]  ;;  %v1265_v9 = vld [vmem:[%s1232_s27 + $0x8] sm:$0xff] }
  0x33   : > { %v1257_v6 = vsel %vm285_vm0, %v1249_v3, -inf  ;;  %429 = vadd.xlane.f32.xlu1 %v289_v4  ;;  %456 = vmax.xlane.f32.xlu2 %v309_v5  ;;  %v312_v11 = vsel %vm285_vm0, %v1262_v8, -inf  ;;  %v1271_v12 = vld [vmem:[%s1232_s27 + $0x28] sm:$0xff]  ;;  %v327_v13 = vld [vmem:[%s1422_s1 + $0x18] sm:$0xff]  ;;  %v326_v14 = vld [vmem:[%s1422_s1 + $0x10] sm:$0xff]  ;;  %v310_v15 = vsel %vm285_vm0, %v1265_v9, -inf }
  0x34   : > { %v314_v10 = vmax.f32 %v309_v5, %v1257_v6  ;;  %425 = vadd.xlane.f32.xlu0 %v286_v7  ;;  %v315_v16 = vsel %vm285_vm0, %v1271_v12, -inf  ;;  %v287_v17 = vsel %vm285_vm0, %v1265_v9, 0.0  ;;  %343 = vmatpush.msra.mxu0 %v327_v13  ;;  %v1286_v18 = vld [vmem:[%s1232_s27 + $0x30] sm:$0xff]  ;;  %v311_v19 = vsel %vm285_vm0, %v1243_v1, -inf  ;;  %v325_v23 = vld [vmem:[%s1422_s1 + $0x8] sm:$0xff]  ;;  %v1294_v24 = vld [vmem:[%s1232_s27 + $0x38] sm:$0xff] }
  0x35   : > { %v316_v21 = vmax.f32 %v310_v15, %v315_v16  ;;  %v288_v22 = vadd.f32 %v287_v17, %v286_v7  ;;  %367 = vmatpush.msra.mxu1 %v327_v13  ;;  %v317_v25 = vsel %vm285_vm0, %v1286_v18, -inf  ;;  %v291_v26 = vsel %vm285_vm0, %v1262_v8, 0.0  ;;  %v324_v31 = vld [vmem:[%s1422_s1] sm:$0xff]  ;;  %s1357_s26 = scalar_lea.vmem [#allocation8], %s816_s10  ;;  %s827_s8 = sshll.u32 %s1143_s22, 3 }
  0x36   : > { %344 = vmatpush.msra.mxu0 %v326_v14  ;;  %v318_v27 = vmax.f32 %v311_v19, %v317_v25  ;;  %v319_v28 = vsel %vm285_vm0, %v1294_v24, -inf  ;;  %v293_v33 = vsel %vm285_vm0, %v1249_v3, 0.0  ;;  %v295_v37 = vsel %vm285_vm0, %v1271_v12, 0.0  ;;  %v377_v52 = vld [vmem:[%s1423_s2] sm:$0x3]  ;;  %s712_s27 = scalar_lea.hbm %s1426_s5, %s827_s8  ;;  %s713_s24 = sshll.u32 %s1357_s26, 4  ;;  %s714_s24 = int_to_ptr.vmem [resolvable:$true] %s713_s24 }
  0x37   : > { %v321_v29 = vmax.f32 %v314_v10, %v316_v21  ;;  %v290_v30 = vadd.f32 %v289_v4, %v288_v22  ;;  %368 = vmatpush.msra.mxu1 %v326_v14  ;;  %v320_v32 = vmax.f32 %v312_v11, %v319_v28  ;;  %v297_v41 = vsel %vm285_vm0, %v1286_v18, 0.0  ;;  %s715_s29 = sshll.u32 %s712_s27, 4  ;;  %s702_s22 = scalar_lea.sflag [#allocation4], %s1226_s28  ;;  %s716_s29 = int_to_ptr.hbm [resolvable:$true] %s715_s29 }
  0x38   : > { %v909_v20 = vpop.eup %908  ;;  %345 = vmatpush.msra.mxu0 %v325_v23  ;;  %v299_v44 = vsel %vm285_vm0, %v1294_v24, 0.0  ;;  %v1088_v50 = vmov 32.0   ;;  %vm382_vm2 = vcmask 1041408   ;;  %v482_v4 = vlaneseq  ;;  %s1024_s11 = sshra.s32 %s716_s29, 4  ;;  %s1030_s15 = scalar_lea.hbm %s1426_s5, 128  ;;  %s1025_s11 = int_to_ptr.hbm [resolvable:$true] %s1024_s11 }
  0x39   : > { %v302_v34 = vmul.f32 8.0, %v909_v20  ;;  %369 = vmatpush.msra.mxu1 %v325_v23  ;;  %v322_v35 = vmax.f32 %v318_v27, %v320_v32  ;;  %v292_v36 = vadd.f32 %v291_v26, %v290_v30  ;;  %vm306_vm1 = vweird.f32 %v909_v20  ;;  %822 = vmatpush.msk.msra.mxu2 %vm382_vm2, %v377_v52  ;;  %s1026_s9 = scalar_lea.hbm %s1025_s11, 64  ;;  %p1031_p11 = scmp.lt.s32.totalorder %s1025_s11, %s1426_s5 }
  0x3a   : > { %346 = vmatpush.msra.mxu0 %v324_v31  ;;  %910 = vrcp.f32 %v1088_v50  ;;  %v1320_v10 = vand.u32 127, %v482_v4  ;;  %vm492_vm4 = vcmask 1041409   ;;  %vm494_vm5 = vcmask 1042434   ;;  %p1027_p1 = scmp.ne.s32.totalorder %s1025_s11, %s1026_s9  ;;  %p1032_p2 = scmp.lt.s32.totalorder %s1030_s15, %s1026_s9 }
  0x3b   : > { %v303_v38 = vsub.f32 1.0, %v302_v34  ;;  %431 = vadd.xlane.f32.xlu1 %v291_v26  ;;  %458 = vmax.xlane.f32.xlu2 %v310_v15  ;;  %v323_v39 = vmax.f32 %v321_v29, %v322_v35  ;;  %v294_v40 = vadd.f32 %v293_v33, %v292_v36  ;;  %vm496_vm6 = vcmask 1043459  }
  0x3c   : > { %427 = vadd.xlane.f32.xlu0 %v287_v17  ;;  %370 = vmatpush.msra.mxu1 %v324_v31  ;;  %vm378_vm7 = vcmask 15360   ;;  %vm498_vm8 = vcmask 1044484   ;;  %vm500_vm9 = vcmask 1045509   ;;  %vm502_vm10 = vcmask 1046534   ;;  %p1028_p4 = pnand %p1027_p1, %p1194_p3  ;;  %p1033_p9 = por %p1032_p2, %p1031_p11 }
  0x3d   : > { %v304_v42 = vmul.f32 %v909_v20, %v303_v38  ;;  %821 = vmatmul.msk.f32.vlgmr.msra.gmra.mxu1 %vm285_vm0, %v323_v39  ;;  %v296_v43 = vadd.f32 %v295_v37, %v294_v40  ;;  %vm504_vm11 = vcmask 1047559  }
  0x3e   : > { %p1029_p8 = pneg %p1028_p4 }
  0x3f   : > { %v305_v45 = vadd.f32 %v909_v20, %v304_v42  ;;  %v298_v46 = vadd.f32 %v297_v41, %v296_v43 }
  0x40   : > { %v911_v51 = vpop.eup %910  ;;  %p1034_p10 = pnand %p1033_p9, %p1029_p8 }
  0x41   : > { %v307_v47 = vsel %vm306_vm1, %v909_v20, %v305_v45  ;;  %v300_v48 = vadd.f32 %v299_v44, %v298_v46  ;;  %v442_v56 = vmul.f32 32.0, %v911_v51  ;;  %vm446_vm3 = vweird.f32 %v911_v51 }
  0x43   : > { %460 = vmax.xlane.f32.xlu1 %v311_v19  ;;  %v308_v49 = vmul.f32 %v307_v47, %v300_v48  ;;  %435 = vadd.xlane.f32.xlu2 %v295_v37  ;;  %v443_v57 = vsub.f32 1.0, %v442_v56 }
  0x44   : > { %433 = vadd.xlane.f32.xlu0 %v293_v33 }
  0x45   : > { %820 = vmatmul.msk.f32.vlgmr.msra.gmra.mxu0 %vm285_vm0, %v308_v49  ;;  %v444_v61 = vmul.f32 %v911_v51, %v443_v57 }
  0x47   : > { %v445_v62 = vadd.f32 %v911_v51, %v444_v61  ;;  %v509_v61 = vld [vmem:[#allocation7 + $0x18] sm:$0xff] }
  0x4b   : > { %437 = vadd.xlane.f32.xlu1 %v297_v41  ;;  %464 = vmax.xlane.f32.xlu2 %v1257_v6  ;;  %v447_v6 = vsel %vm446_vm3, %v911_v51, %v445_v62 }
  0x4c   : > { %462 = vmax.xlane.f32.xlu0 %v312_v11 }
  0x53   : > { %466 = vmax.xlane.f32.xlu1 %v315_v16  ;;  %468 = vmax.xlane.f32.xlu2 %v317_v25 }
  0x54   : > { %439 = vadd.xlane.f32.xlu0 %v299_v44 }
  0x5c   : > { %470 = vmax.xlane.f32.xlu0 %v319_v28 }
  0xa6   : > { %v430_v53 = vpop.xlane.xlu1 %429  ;;  %v457_v54 = vpop.xlane.xlu2 %456 }
  0xa7   : > { %v426_v55 = vpop.xlane.xlu0 %425  ;;  %v450_v14 = vmul.f32 %v447_v6, %v430_v53  ;;  %v518_v28 = vperm.slane %v457_v54, %v1320_v10 }
  0xa8   : > { %v448_v11 = vmul.f32 %v447_v6, %v426_v55 }
  0xa9   : > { %v486_v26 = vperm.slane %v450_v14, %v1320_v10  ;;  %v540_v14 = vld [vmem:[#allocation7] sm:$0xff] }
  0xaa   : > { %v484_v17 = vperm.slane %v448_v11, %v1320_v10 }
  0xae   : > { %v432_v58 = vpop.xlane.xlu1 %431  ;;  %v459_v59 = vpop.xlane.xlu2 %458 }
  0xaf   : > { %v428_v60 = vpop.xlane.xlu0 %427  ;;  %v451_v20 = vmul.f32 %v447_v6, %v432_v58  ;;  %v519_v31 = vperm.slane %v459_v59, %v1320_v10 }
  0xb0   : > { %v449_v7 = vmul.f32 %v447_v6, %v428_v60  ;;  %v473_v60 = vld [vmem:[#allocation5 + $0x18] sm:$0xff] }
  0xb1   : > { %v487_v30 = vperm.slane %v451_v20, %v1320_v10  ;;  %v526_v41 = vsel %vm492_vm4, %v519_v31, %v518_v28  ;;  %v631_v28 = vshrl.u32 %v482_v4, 7 }
  0xb2   : > { %v485_v13 = vperm.slane %v449_v7, %v1320_v10 }
  0xb3   : > { %907 = vset.pattern.permute.xlu0 %v631_v28  ;;  %906 = vset.pattern.permute.xlu2 %v631_v28 }
  0xb4   : > { %v493_v22 = vsel %vm492_vm4, %v485_v13, %v484_v17  ;;  %905 = vset.pattern.permute.xlu1 %v631_v28 }
  0xb5   : > { %v495_v32 = vsel %vm494_vm5, %v486_v26, %v493_v22 }
  0xb6   : > { %v461_v63 = vpop.xlane.xlu1 %460  ;;  %v436_v0 = vpop.xlane.xlu2 %435  ;;  %v497_v42 = vsel %vm496_vm6, %v487_v30, %v495_v32  ;;  %v560_v32 = vld [vmem:[#allocation7 + $0x10] sm:$0xff] }
  0xb7   : > { %v434_v5 = vpop.xlane.xlu0 %433  ;;  %v453_v33 = vmul.f32 %v447_v6, %v436_v0  ;;  %v520_v34 = vperm.slane %v461_v63, %v1320_v10 }
  0xb8   : > { %v452_v23 = vmul.f32 %v447_v6, %v434_v5  ;;  %v536_v5 = vld [vmem:[#allocation5] sm:$0xff] }
  0xb9   : > { %v489_v43 = vperm.slane %v453_v33, %v1320_v10  ;;  %v527_v45 = vsel %vm494_vm5, %v520_v34, %v526_v41 }
  0xba   : > { %v372_v16 = vpop.f32.mrf.mxu1  ;;  %v488_v35 = vperm.slane %v452_v23, %v1320_v10  ;;  %v550_v23 = vld [vmem:[#allocation7 + $0x8] sm:$0xff] }
  0xbb   : > { %v375_v25 = vmax.f32 %v372_v16, 0.0 }
  0xbc   : > { %v499_v46 = vsel %vm498_vm8, %v488_v35, %v497_v42 }
  0xbd   : > { %v501_v53 = vsel %vm500_vm9, %v489_v43, %v499_v46 }
  0xbe   : > { %v438_v15 = vpop.xlane.xlu1 %437  ;;  %v465_v21 = vpop.xlane.xlu2 %464 }
  0xbf   : > { %v463_v19 = vpop.xlane.xlu0 %462  ;;  %v454_v36 = vmul.f32 %v447_v6, %v438_v15  ;;  %v522_v48 = vperm.slane %v465_v21, %v1320_v10 }
  0xc0   : > { %v521_v38 = vperm.slane %v463_v19, %v1320_v10  ;;  %v545_v19 = vld [vmem:[#allocation5 + $0x8] sm:$0xff] }
  0xc1   : > { %v490_v47 = vperm.slane %v454_v36, %v1320_v10  ;;  %v565_v36 = vld [vmem:[#allocation5 + $0x20] sm:$0xff] }
  0xc2   : > { %v348_v27 = vpop.f32.mrf.mxu0  ;;  %v528_v49 = vsel %vm496_vm6, %v521_v38, %v527_v45 }
  0xc3   : > { %v351_v29 = vmax.f32 %v348_v27, 0.0  ;;  %v503_v54 = vsel %vm502_vm10, %v490_v47, %v501_v53  ;;  %v529_v55 = vsel %vm498_vm8, %v522_v48, %v528_v49  ;;  %v555_v27 = vld [vmem:[#allocation5 + $0x10] sm:$0xff]  ;;  %v580_v47 = vld [vmem:[#allocation7 + $0x28] sm:$0xff] }
  0xc5   : > { %v376_v37 = vadd.f32 %v375_v25, %v351_v29 }
  0xc6   : > { %v467_v39 = vpop.xlane.xlu1 %466  ;;  %v469_v52 = vpop.xlane.xlu2 %468 }
  0xc7   : > { %823 = vmatmul.msk.f32.vlgmr.msra.gmra.mxu2 %vm378_vm7, %v376_v37  ;;  %v440_v40 = vpop.xlane.xlu0 %439  ;;  %v523_v50 = vperm.slane %v467_v39, %v1320_v10  ;;  %v524_v56 = vperm.slane %v469_v52, %v1320_v10 }
  0xc8   : > { %v455_v44 = vmul.f32 %v447_v6, %v440_v40  ;;  %v570_v40 = vld [vmem:[#allocation7 + $0x20] sm:$0xff] }
  0xc9   : > { %v530_v57 = vsel %vm500_vm9, %v523_v50, %v529_v55  ;;  %v590_v55 = vld [vmem:[#allocation7 + $0x30] sm:$0xff] }
  0xca   : > { %v491_v51 = vperm.slane %v455_v44, %v1320_v10  ;;  %v531_v0 = vsel %vm502_vm10, %v524_v56, %v530_v57  ;;  %v575_v44 = vld [vmem:[#allocation5 + $0x28] sm:$0xff] }
  0xcc   : > { %v505_v58 = vsel %vm504_vm11, %v491_v51, %v503_v54  ;;  %v585_v51 = vld [vmem:[#allocation5 + $0x30] sm:$0xff] }
  0xcd   : > { %v537_v63 = vrot.slane %v505_v58, 5  ;;  %v507_v7 = vmul.f32 %v505_v58, %v473_v60  ;;  %v546_v16 = vrot.slane %v505_v58, 6  ;;  %v556_v26 = vrot.slane %v505_v58, 7 }
  0xce   : > { %v566_v34 = vrot.slane %v505_v58, 1  ;;  %v576_v42 = vrot.slane %v505_v58, 2  ;;  %v586_v49 = vrot.slane %v505_v58, 3 }
  0xcf   : > { %v471_v59 = vpop.xlane.xlu0 %470  ;;  %v538_v15 = vmul.f32 %v537_v63, %v536_v5  ;;  %v547_v25 = vmul.f32 %v546_v16, %v545_v19  ;;  %v557_v33 = vmul.f32 %v556_v26, %v555_v27 }
  0xd0   : > { %v525_v62 = vperm.slane %v471_v59, %v1320_v10  ;;  %v567_v41 = vmul.f32 %v566_v34, %v565_v36  ;;  %v577_v48 = vmul.f32 %v576_v42, %v575_v44  ;;  %v587_v56 = vmul.f32 %v586_v49, %v585_v51 }
  0xd1   : > { %v616_v44 = vmul.f32 %v1262_v8, %v1262_v8  ;;  %v620_v51 = vmul.f32 %v1294_v24, %v1294_v24 }
  0xd2   : > { %v532_v6 = vsel %vm504_vm11, %v525_v62, %v531_v0 }
  0xd3   : > { %v534_v11 = vmul.f32 %v532_v6, %v509_v61  ;;  %v541_v13 = vrot.slane %v532_v6, 5  ;;  %v551_v22 = vrot.slane %v532_v6, 6  ;;  %v561_v31 = vrot.slane %v532_v6, 7 }
  0xd4   : > { %v571_v39 = vrot.slane %v532_v6, 1  ;;  %v581_v46 = vrot.slane %v532_v6, 2  ;;  %v591_v54 = vrot.slane %v532_v6, 3 }
  0xd5   : > { %v535_v17 = vadd.f32 %v534_v11, %v507_v7  ;;  %v542_v21 = vmul.f32 %v541_v13, %v540_v14  ;;  %v552_v30 = vmul.f32 %v551_v22, %v550_v23  ;;  %v562_v38 = vmul.f32 %v561_v31, %v560_v32 }
  0xd6   : > { %v572_v45 = vmul.f32 %v571_v39, %v570_v40  ;;  %v582_v53 = vmul.f32 %v581_v46, %v580_v47  ;;  %v592_v60 = vmul.f32 %v591_v54, %v590_v55  ;;  %v614_v39 = vmul.f32 %v1265_v9, %v1265_v9 }
  0xd7   : > { %v539_v20 = vadd.f32 %v538_v15, %v535_v17  ;;  %v618_v9 = vmul.f32 %v1271_v12, %v1271_v12 }
  0xd9   : > { %v543_v10 = vadd.f32 %v542_v21, %v539_v20 }
  0xdb   : > { %v548_v29 = vadd.f32 %v547_v25, %v543_v10 }
  0xdd   : > { %v553_v35 = vadd.f32 %v552_v30, %v548_v29 }
  0xdf   : > { %v558_v37 = vadd.f32 %v557_v33, %v553_v35 }
  0xe1   : > { %v563_v43 = vadd.f32 %v562_v38, %v558_v37 }
  0xe3   : > { %v568_v4 = vadd.f32 %v567_v41, %v563_v43 }
  0xe5   : > { %v573_v50 = vadd.f32 %v572_v45, %v568_v4 }
  0xe7   : > { %v578_v52 = vadd.f32 %v577_v48, %v573_v50  ;;  %v615_v50 = vmul.f32 %v1243_v1, %v1243_v1 }
  0xe9   : > { %v583_v57 = vadd.f32 %v582_v53, %v578_v52  ;;  %v613_v52 = vmul.f32 %v1246_v2, %v1246_v2  ;;  %v617_v2 = vmul.f32 %v1249_v3, %v1249_v3 }
  0xeb   : > { %v588_v59 = vadd.f32 %v587_v56, %v583_v57 }
  0xed   : > { %v593_v61 = vadd.f32 %v592_v60, %v588_v59 }
  0xef   : > { %v825_v62 = vmul.f32 -1.442695, %v593_v61 }
  0xf1   : > { %912 = vpow2.f32 %v825_v62 }
  0xf7   : > { %v913_v63 = vpop.eup %912 }
  0xf8   : > { %v597_v0 = vadd.f32 1.0, %v913_v63  ;;  %v619_v63 = vmul.f32 %v1286_v18, %v1286_v18 }
  0xfa   : > { %914 = vrcp.f32 %v597_v0  ;;  %v609_v58 = vand.u32 2147483648, %v597_v0  ;;  %v607_v14 = vand.u32 2147483647, %v597_v0  ;;  %vm603_vm13 = vweird.f32 %v597_v0 }
  0xfc   : > { %v610_v6 = vor.u32 1.1754944e-38, %v609_v58  ;;  %vm608_vm15 = vcmp.eq.f32.partialorder %v607_v14, 8.507059e+37 }
 0x100   : > { %v915_v5 = vpop.eup %914 }
 0x101   : > { %v599_v7 = vmul.f32 %v915_v5, %v597_v0  ;;  %vm604_vm12 = vweird.f32 %v915_v5 }
 0x102   : > { %vm605_vm14 = vmor %vm603_vm13, %vm604_vm12 }
 0x103   : > { %v600_v11 = vsub.f32 1.0, %v599_v7 }
 0x105   : > { %v601_v13 = vmul.f32 %v915_v5, %v600_v11 }
 0x107   : > { %v602_v15 = vadd.f32 %v915_v5, %v601_v13 }
 0x109   : > { %v606_v16 = vsel %vm605_vm14, %v915_v5, %v602_v15 }
 0x10a   : > { %v611_v17 = vsel %vm608_vm15, %v610_v6, %v606_v16 }
 0x10b   : > { %v643_v19 = vperm.slane %v611_v17, 2  ;;  %v636_v20 = vperm.slane %v611_v17, 1  ;;  %v629_v21 = vperm.slane %v611_v17, 0  ;;  %v650_v22 = vperm.slane %v611_v17, 3 }
 0x10c   : > { %v657_v23 = vperm.slane %v611_v17, 4  ;;  %v664_v25 = vperm.slane %v611_v17, 5  ;;  %v671_v26 = vperm.slane %v611_v17, 6  ;;  %v678_v10 = vperm.slane %v611_v17, 7 }
 0x10d   : > { %648 = vperm.xlu0 %907, %v643_v19   ;;  %641 = vperm.xlu2 %906, %v636_v20  }
 0x10e   : > { %634 = vperm.xlu1 %905, %v629_v21  }
 0x115   : > { %655 = vperm.xlu2 %906, %v650_v22  }
 0x116   : > { %662 = vperm.xlu1 %905, %v657_v23  }
 0x11d   : > { %669 = vperm.xlu2 %906, %v664_v25  }
 0x11e   : > { %676 = vperm.xlu1 %905, %v671_v26  }
 0x125   : > { %683 = vperm.xlu2 %906, %v678_v10  }
 0x14a   : > { %v403_v27 = vpop.f32.mrf.mxu2 }
 0x14b   : > { %v824_v28 = vmul.f32 -1.442695, %v403_v27 }
 0x14d   : > { %916 = vpow2.f32 %v824_v28 }
 0x153   : > { %v917_v29 = vpop.eup %916 }
 0x154   : > { %v409_v30 = vadd.f32 1.0, %v917_v29 }
 0x156   : > { %918 = vrcp.f32 %v409_v30  ;;  %v421_v33 = vand.u32 2147483648, %v409_v30  ;;  %vm415_vm1 = vweird.f32 %v409_v30  ;;  %v419_v35 = vand.u32 2147483647, %v409_v30 }
 0x158   : > { %v422_v37 = vor.u32 1.1754944e-38, %v421_v33  ;;  %vm420_vm4 = vcmp.eq.f32.partialorder %v419_v35, 8.507059e+37 }
 0x15c   : > { %v919_v31 = vpop.eup %918 }
 0x15d   : > { %v411_v32 = vmul.f32 %v919_v31, %v409_v30  ;;  %vm416_vm2 = vweird.f32 %v919_v31 }
 0x15e   : > { %vm417_vm3 = vmor %vm415_vm1, %vm416_vm2 }
 0x15f   : > { %v412_v34 = vsub.f32 1.0, %v411_v32 }
 0x161   : > { %v413_v36 = vmul.f32 %v919_v31, %v412_v34 }
 0x163   : > { %v414_v38 = vadd.f32 %v919_v31, %v413_v36 }
 0x165   : > { %v418_v40 = vsel %vm417_vm3, %v919_v31, %v414_v38 }
 0x166   : > { %v423_v41 = vsel %vm420_vm4, %v422_v37, %v418_v40 }
 0x167   : > { %v642_v42 = vpop.permute.xlu2 %641  ;;  %v622_v43 = vmul.f32 %v614_v39, %v423_v41  ;;  %v624_v45 = vmul.f32 %v616_v44, %v423_v41  ;;  %v626_v48 = vmul.f32 %v618_v9, %v423_v41  ;;  %v623_v12 = vmul.f32 %v615_v50, %v423_v41 }
 0x168   : > { %v628_v53 = vmul.f32 %v620_v51, %v423_v41  ;;  %v621_v54 = vmul.f32 %v613_v52, %v423_v41  ;;  %v625_v24 = vmul.f32 %v617_v2, %v423_v41  ;;  %v627_v3 = vmul.f32 %v619_v63, %v423_v41 }
 0x169   : > { %v686_v4 = vmul.f32 %v642_v42, %v622_v43 }
 0x16b   : > { %694 = vst.msk [vmem:[%s1357_s26 + $0x8] sm:$0xff] %vm285_vm0, %v686_v4 }
 0x16f   : > { %v656_v46 = vpop.permute.xlu2 %655 }
 0x170   : > { %v688_v47 = vmul.f32 %v656_v46, %v624_v45 }
 0x172   : > { %696 = vst.msk [vmem:[%s1357_s26 + $0x18] sm:$0xff] %vm285_vm0, %v688_v47 }
 0x177   : > { %v670_v8 = vpop.permute.xlu2 %669 }
 0x178   : > { %v690_v49 = vmul.f32 %v670_v8, %v626_v48 }
 0x17a   : > { %698 = vst.msk [vmem:[%s1357_s26 + $0x28] sm:$0xff] %vm285_vm0, %v690_v49 }
 0x17f   : > { %v649_v55 = vpop.permute.xlu0 %648  ;;  %v684_v56 = vpop.permute.xlu2 %683 }
 0x180   : > { %v687_v57 = vmul.f32 %v649_v55, %v623_v12  ;;  %v692_v59 = vmul.f32 %v684_v56, %v628_v53  ;;  %v635_v1 = vpop.permute.xlu1 %634 }
 0x181   : > { %v685_v60 = vmul.f32 %v635_v1, %v621_v54 }
 0x182   : > { %695 = vst.msk [vmem:[%s1357_s26 + $0x10] sm:$0xff] %vm285_vm0, %v687_v57 }
 0x183   : > { %700 = vst.msk [vmem:[%s1357_s26 + $0x38] sm:$0xff] %vm285_vm0, %v692_v59 }
 0x184   : > { %693 = vst.msk [vmem:[%s1357_s26] sm:$0xff] %vm285_vm0, %v685_v60 }
 0x188   : > { %v663_v61 = vpop.permute.xlu1 %662 }
 0x189   : > { %v689_v62 = vmul.f32 %v663_v61, %v625_v24 }
 0x18b   : > { %697 = vst.msk [vmem:[%s1357_s26 + $0x20] sm:$0xff] %vm285_vm0, %v689_v62 }
 0x190   : > { %v677_v0 = vpop.permute.xlu1 %676 }
 0x191   : > { %v691_v5 = vmul.f32 %v677_v0, %v627_v3 }
 0x193   : > { %699 = vst.msk [vmem:[%s1357_s26 + $0x30] sm:$0xff] %vm285_vm0, %v691_v5 }
 0x194   : > { %1037 = shalt.err (!%p1034_p10)
}
 0x195   : > { %s1089_s28 = smov 128   ;;  %s1090_s7 = smov 256  }
 0x196   : > { %s1091_s26 = smov 8  }
 0x197   : > { %840 = dma.vmem_to_hbm [thread:$0]  (%p1194_p3), %s714_s24, 1024, %s716_s29, %s702_s22, %s1089_s28, %s1090_s7, %s1091_s26  }
 0x198 PF: > { %s730_s8 = sand.u32 1, %s1068_s18   ;;  %p1434_p12 = scmp.ge.s32.totalorder %s1080_s21, 2 }
 0x199   : > { %s731_s10 = scalar_lea.sflag [#allocation4], %s730_s8 }
 0x19a   : > { %p854_p13 = pnand %p1434_p12, %p1157_p6 }
 0x19c   : > { %p855_p0 = pneg %p854_p13 }
 0x19e   : > { %1063 = dma.done.wait (%p855_p0), %s731_s10, 1024  }
 0x19f   : > { %1065 = vsyncadd (%p855_p0), %s731_s10, 4294966272  ;;  %p19_p5 = scmp.ge.s32.totalorder %s1184_s14, 4   ;;  %s1435_s18 = smov %s1072_s19 }
 0x1a0   : > { %s1436_s19 = smov %s1076_s20  ;;  %s1437_s20 = smov %s1200_s23 }
 0x1a1   : > { %s1438_s21 = smov %s1184_s14  ;;  %21 = sbr.rel (!%p19_p5) target bundleno = 6 (0x6), region = 105 }
 0x1a6   :  { %737 = vsyncpa [#allocation3], 1 }
 0x1a7   :  { %739 = vsyncpa [#allocation3 + $0x1], 1 }
 0x1a8   :  { %740 = vsyncpa [#allocation6], 1 }
 0x1a9   :  { %741 = vsyncpa [#allocation4], 1 }
 0x1aa   :  { %743 = vsyncpa [#allocation4 + $0x1], 1 }

</bundles_post_ra>
